<compile_context>
chip_gen: v6e
topology: v6e:2x2x1
jax: 0.10.0
libtpu: 0.0.40
codegen_flags: <defaults>
</compile_context>

<pallas_src>
import jax
import jax.numpy as jnp
from jax.experimental import pallas as pl
from jax.experimental.pallas import tpu as pltpu

LANDSCAPE_DIM = 2      # from Ellipse_Net.__init__
MEAN_BOUNDARY = 10.0
EIGEN_MEAN = 1.0
EIGEN_STD = 0.2
HEIGHT_BOUNDARY = 5.0

LANE = 128             # lane width (last dim of every tile)
SUB = 8                # sublane count (second-to-last dim multiple)
_MAX_TILE_ROWS = 512   # <= ~2.5 MiB/step double-buffered; fine on v5e/v6e/v7x
_SMALL_BATCH = 8192    # below this, a single XLA fusion beats a kernel launch


def ellipse_kernel(p_ref, x_ref, out_ref):
    # p_ref:   (8,)           SMEM  [m0, m1, 2*a00, 2*a01, 2*a10, 2*a11, h, 0]
    # x_ref:   (2, TR, 128)   VMEM  query points, dim on axis 0, batch dense
    # out_ref: (3, TR, 128)   VMEM  row 0: (x-m)^T A (x-m) + h ; rows 1..2: grad
    m0, m1 = p_ref[0], p_ref[1]
    b00, b01, b10, b11 = p_ref[2], p_ref[3], p_ref[4], p_ref[5]   # B = 2*A
    h = p_ref[6]

    d0 = x_ref[0] - m0                      # (TR, 128) dense VPU tiles
    d1 = x_ref[1] - m1
    g0 = b00 * d0 + b01 * d1                # grad = 2 * A (x - m)
    g1 = b10 * d0 + b11 * d1

    out_ref[0] = 0.5 * (d0 * g0 + d1 * g1) + h   # value
    out_ref[1] = g0                              # dense, unmasked stores
    out_ref[2] = g1


def _ellipse_ref(x, m, A, height):
    """Pure-JAX fused path (used for small batches / as reference)."""
    diff = x.astype(jnp.float32) - jnp.reshape(m, (1, LANDSCAPE_DIM))
    vals = jnp.einsum("bi,ij,bj->b", diff, A, diff) + height
    grads = 2.0 * diff @ A.T                 # == (2*A @ (x-m)) per point
    return vals, grads


def ellipse_net_forward(x, m, A, height, *, force_pallas=False,
                        tile_rows=_MAX_TILE_ROWS):
    """Batched evaluate + grad of the ellipse landscape.

    x: (B, 2) float32 query points.
    Returns (values: (B,), grads: (B, 2)).
    """
    B, D = x.shape
    assert D == LANDSCAPE_DIM

    if B < _SMALL_BATCH and not force_pallas:
        # Launch + layout overhead dominates at tiny B; stay in one XLA fusion.
        return _ellipse_ref(x, m, A, height)

    # ---- dense tile layout: batch -> (rows of 128 lanes), rows padded to 8 --
    R = -(-B // LANE)                                    # ceil(B / 128)
    TR = min(max(tile_rows, SUB), max(SUB, -(-R // SUB) * SUB))
    TR = -(-TR // SUB) * SUB                             # multiple of 8
    R_pad = -(-R // TR) * TR                             # multiple of TR
    Bp = R_pad * LANE

    x_t = jnp.transpose(x.astype(jnp.float32))           # (2, B), single pass
    if Bp != B:
        x_t = jnp.pad(x_t, ((0, 0), (0, Bp - B)))
    x_t = x_t.reshape(LANDSCAPE_DIM, R_pad, LANE)         # (2, R_pad, 128)

    m_f = jnp.reshape(jnp.asarray(m, jnp.float32), (LANDSCAPE_DIM,))
    a2_f = 2.0 * jnp.reshape(jnp.asarray(A, jnp.float32), (4,))   # fold 2 into A
    h_f = jnp.reshape(jnp.asarray(height, jnp.float32), (1,))
    params = jnp.concatenate([m_f, a2_f, h_f, jnp.zeros((1,), jnp.float32)])

    grid = (R_pad // TR,)
    out = pl.pallas_call(
        ellipse_kernel,
        out_shape=jax.ShapeDtypeStruct((3, R_pad, LANE), jnp.float32),
        grid=grid,
        in_specs=[
            pl.BlockSpec(memory_space=pltpu.MemorySpace.SMEM),              # params
            pl.BlockSpec((LANDSCAPE_DIM, TR, LANE), lambda i: (0, i, 0)),   # x
        ],
        out_specs=pl.BlockSpec((3, TR, LANE), lambda i: (0, i, 0)),
        compiler_params=pltpu.CompilerParams(
            dimension_semantics=("parallel",)),        # v7x: both TCs; harmless elsewhere
        cost_estimate=pl.CostEstimate(
            flops=10 * Bp,
            transcendentals=0,
            bytes_accessed=(2 + 3) * Bp * 4 + 8 * 4),
    )(params, x_t)

    # TODO(synk): consumers that keep working in the (3, R, 128) tile layout
    # can take `out` directly and skip this unpack pass.
    flat = out.reshape(3, Bp)
    vals = flat[0, :B]
    grads = flat[1:, :B].T
    return vals, grads


def sample_ellipse_params(key):
    """Deterministic analogue of Ellipse.sample_ellipse (dim = 2)."""
    k_m, k_eig, k_rot, k_h = jax.random.split(key, 4)
    m = jax.random.uniform(k_m, (LANDSCAPE_DIM,),
                           minval=-MEAN_BOUNDARY, maxval=MEAN_BOUNDARY)
    # positive eigenvalues ~ N(eigen_mean, eigen_std), clamped positive
    eigens = jnp.clip(
        EIGEN_MEAN + EIGEN_STD * jax.random.normal(k_eig, (LANDSCAPE_DIM,)),
        0.05, None)
    # 2D orthogonal basis (rotation) replaces scipy ortho_group.rvs
    theta = jax.random.uniform(k_rot, (), minval=0.0, maxval=2.0 * jnp.pi)
    c, s = jnp.cos(theta), jnp.sin(theta)
    basis = jnp.array([[c, -s], [s, c]], dtype=jnp.float32)
    A = basis.T @ jnp.diag(eigens) @ basis        # symmetric, as in the module
    height = jax.random.uniform(k_h, (), minval=0.0, maxval=HEIGHT_BOUNDARY)
    return (m.astype(jnp.float32), A.astype(jnp.float32),
            height.astype(jnp.float32))


if __name__ == "__main__":
    key = jax.random.PRNGKey(0)
    k_params, k_x = jax.random.split(key)

    m, A, height = sample_ellipse_params(k_params)

    # Batch of query points (like the landscape sampling in Ellipse_Net.plot).
    # B deliberately NOT a multiple of 128 to exercise the pad/slice path.
    B = 300
    x = jax.random.uniform(k_x, (B, LANDSCAPE_DIM),
                           minval=-MEAN_BOUNDARY, maxval=MEAN_BOUNDARY
                           ).astype(jnp.float32)

    # force_pallas=True so the kernel itself is exercised at this small size.
    vals, grads = ellipse_net_forward(x, m, A, height, force_pallas=True)
    vals = jax.block_until_ready(vals)
    grads = jax.block_until_ready(grads)

    # Pure-JAX reference: (x-m)^T A (x-m) + h ; 2 A (x-m)
    ref_vals, ref_grads = _ellipse_ref(x, m, A, height)

    assert vals.shape == (B,) and grads.shape == (B, LANDSCAPE_DIM)
    assert jnp.allclose(vals, ref_vals, atol=1e-4, rtol=1e-4), (vals, ref_vals)
    assert jnp.allclose(grads, ref_grads, atol=1e-4, rtol=1e-4), (grads, ref_grads)

    # TODO(synk): Ellipse_Net.forward() itself returns None in the reference
    # module; the kernel exposes evaluate()/grad(), which is its numeric core.
    # Note: grad uses the module's 2*A(x-m) definition; for asymmetric A the
    # analytic gradient of the quadratic form would be (A+A^T)(x-m).
    print("KERNEL_OK")
</pallas_src>

<mosaic_0001>
module attributes {stable_mosaic.version = 11 : i64} {
  func.func @ellipse_kernel(%arg0: i32, %arg1: memref<8xf32, #tpu.memory_space<smem>>, %arg2: memref<2x8x128xf32, #tpu.memory_space<vmem>>, %arg3: memref<3x8x128xf32, #tpu.memory_space<vmem>>) attributes {dimension_semantics = [#tpu.dimension_semantics<parallel>], iteration_bounds = array<i64: 1>, scalar_prefetch = 0 : i64, scratch_operands = 0 : i64, tpu.core_type = #tpu.core_type<tc>, window_params = [{transform_indices = @transform_0, window_bounds = array<i64: 8>}, {transform_indices = @transform_1, window_bounds = array<i64: 2, 8, 128>}, {transform_indices = @transform_2, window_bounds = array<i64: 3, 8, 128>}]} {
    %c0 = arith.constant 0 : index
    %0 = memref.load %arg1[%c0] : memref<8xf32, #tpu.memory_space<smem>>
    %c1 = arith.constant 1 : index
    %1 = memref.load %arg1[%c1] : memref<8xf32, #tpu.memory_space<smem>>
    %c2 = arith.constant 2 : index
    %2 = memref.load %arg1[%c2] : memref<8xf32, #tpu.memory_space<smem>>
    %c3 = arith.constant 3 : index
    %3 = memref.load %arg1[%c3] : memref<8xf32, #tpu.memory_space<smem>>
    %c4 = arith.constant 4 : index
    %4 = memref.load %arg1[%c4] : memref<8xf32, #tpu.memory_space<smem>>
    %c5 = arith.constant 5 : index
    %5 = memref.load %arg1[%c5] : memref<8xf32, #tpu.memory_space<smem>>
    %c6 = arith.constant 6 : index
    %6 = memref.load %arg1[%c6] : memref<8xf32, #tpu.memory_space<smem>>
    %c0_0 = arith.constant 0 : index
    %c0_1 = arith.constant 0 : index
    %c0_2 = arith.constant 0 : index
    %7 = vector.load %arg2[%c0_0, %c0_1, %c0_2] : memref<2x8x128xf32, #tpu.memory_space<vmem>>, vector<1x8x128xf32>
    %8 = vector.shape_cast %7 : vector<1x8x128xf32> to vector<8x128xf32>
    %9 = vector.broadcast %0 : f32 to vector<8x128xf32>
    %10 = arith.subf %8, %9 : vector<8x128xf32>
    %c1_3 = arith.constant 1 : index
    %c0_4 = arith.constant 0 : index
    %c0_5 = arith.constant 0 : index
    %11 = vector.load %arg2[%c1_3, %c0_4, %c0_5] : memref<2x8x128xf32, #tpu.memory_space<vmem>>, vector<1x8x128xf32>
    %12 = vector.shape_cast %11 : vector<1x8x128xf32> to vector<8x128xf32>
    %13 = vector.broadcast %1 : f32 to vector<8x128xf32>
    %14 = arith.subf %12, %13 : vector<8x128xf32>
    %15 = vector.broadcast %2 : f32 to vector<8x128xf32>
    %16 = arith.mulf %15, %10 : vector<8x128xf32>
    %17 = vector.broadcast %3 : f32 to vector<8x128xf32>
    %18 = arith.mulf %17, %14 : vector<8x128xf32>
    %19 = arith.addf %16, %18 : vector<8x128xf32>
    %20 = vector.broadcast %4 : f32 to vector<8x128xf32>
    %21 = arith.mulf %20, %10 : vector<8x128xf32>
    %22 = vector.broadcast %5 : f32 to vector<8x128xf32>
    %23 = arith.mulf %22, %14 : vector<8x128xf32>
    %24 = arith.addf %21, %23 : vector<8x128xf32>
    %25 = arith.mulf %10, %19 : vector<8x128xf32>
    %26 = arith.mulf %14, %24 : vector<8x128xf32>
    %27 = arith.addf %25, %26 : vector<8x128xf32>
    %cst = arith.constant 5.000000e-01 : f32
    %28 = vector.broadcast %cst : f32 to vector<8x128xf32>
    %29 = arith.mulf %28, %27 : vector<8x128xf32>
    %30 = vector.broadcast %6 : f32 to vector<8x128xf32>
    %31 = arith.addf %29, %30 : vector<8x128xf32>
    %c0_6 = arith.constant 0 : index
    %c0_7 = arith.constant 0 : index
    %c0_8 = arith.constant 0 : index
    %32 = vector.load %arg3[%c0_6, %c0_7, %c0_8] : memref<3x8x128xf32, #tpu.memory_space<vmem>>, vector<1x8x128xf32>
    %33 = vector.shape_cast %32 : vector<1x8x128xf32> to vector<8x128xf32>
    %34 = vector.shape_cast %31 : vector<8x128xf32> to vector<1x8x128xf32>
    tpu.vector_store %arg3[%c0_6, %c0_7, %c0_8], %34 {strides = array<i32>} : memref<3x8x128xf32, #tpu.memory_space<vmem>>, vector<1x8x128xf32>,
    %c1_9 = arith.constant 1 : index
    %c0_10 = arith.constant 0 : index
    %c0_11 = arith.constant 0 : index
    %35 = vector.load %arg3[%c1_9, %c0_10, %c0_11] : memref<3x8x128xf32, #tpu.memory_space<vmem>>, vector<1x8x128xf32>
    %36 = vector.shape_cast %35 : vector<1x8x128xf32> to vector<8x128xf32>
    %37 = vector.shape_cast %19 : vector<8x128xf32> to vector<1x8x128xf32>
    tpu.vector_store %arg3[%c1_9, %c0_10, %c0_11], %37 {strides = array<i32>} : memref<3x8x128xf32, #tpu.memory_space<vmem>>, vector<1x8x128xf32>,
    %c2_12 = arith.constant 2 : index
    %c0_13 = arith.constant 0 : index
    %c0_14 = arith.constant 0 : index
    %38 = vector.load %arg3[%c2_12, %c0_13, %c0_14] : memref<3x8x128xf32, #tpu.memory_space<vmem>>, vector<1x8x128xf32>
    %39 = vector.shape_cast %38 : vector<1x8x128xf32> to vector<8x128xf32>
    %40 = vector.shape_cast %24 : vector<8x128xf32> to vector<1x8x128xf32>
    tpu.vector_store %arg3[%c2_12, %c0_13, %c0_14], %40 {strides = array<i32>} : memref<3x8x128xf32, #tpu.memory_space<vmem>>, vector<1x8x128xf32>,
    return
  }
  func.func @transform_0(%arg0: i32) -> i32 {
    %c0_i32 = arith.constant 0 : i32
    %c0_i32_0 = arith.constant 0 : i32
    return %c0_i32 : i32
  }
  func.func @transform_1(%arg0: i32) -> (i32, i32, i32) {
    %c0_i32 = arith.constant 0 : i32
    %c0_i32_0 = arith.constant 0 : i32
    %c0_i32_1 = arith.constant 0 : i32
    return %c0_i32, %arg0, %c0_i32_0 : i32, i32, i32
  }
  func.func @transform_2(%arg0: i32) -> (i32, i32, i32) {
    %c0_i32 = arith.constant 0 : i32
    %c0_i32_0 = arith.constant 0 : i32
    %c0_i32_1 = arith.constant 0 : i32
    return %c0_i32, %arg0, %c0_i32_0 : i32, i32, i32
  }
}

</mosaic_0001>

<bundles_post_ra>
// kernel: tpu_custom_call.1
= control target key start
LH: loop header
LB: loop body
LE: loop exit
PB: predicated region body
PF: predicated region fallthrough
CT: control target
= control target key end

     0   :  { %7 = vsyncpa [#allocation5], 0  ;;  %s190_s0 = inlined_call_operand.hbm [shape: f32[8], index: 0, kind: input, shape index: {}]   ;;  %s191_s1 = inlined_call_operand.hbm [shape: f32[2,8,128], index: 1, kind: input, shape index: {}]   ;;  %s192_s2 = inlined_call_operand.hbm [shape: f32[3,8,128], index: 2, kind: output, shape index: {}]  }
   0x1   :  { %8 = vsyncpa [#allocation3], 0 }
   0x2   :  { %9 = vsyncpa [#allocation4], 0  ;;  %s155_s9 = smov [#allocation2]   ;;  %s156_s12 = smov [#allocation6]  }
   0x3   :  { %17 = dma.hbm_to_smem %s190_s0, 16, %s155_s9, [#allocation5]  }
   0x4   :  { %s23_s13 = sshll.u32 %s156_s12, 4  ;;  %s24_s13 = int_to_ptr.vmem [resolvable:$true] %s23_s13 }
   0x5   :  { %s117_s14 = scalar_lea.vmem %s24_s13, 256  ;;  %p122_p1 = scmp.lt.s32.totalorder %s24_s13, %s24_s13 }
   0x6   :  { %p118_p0 = scmp.ne.s32.totalorder %s24_s13, %s117_s14  ;;  %p123_p2 = scmp.lt.s32.totalorder %s117_s14, %s117_s14 }
   0x8   :  { %p124_p3 = por %p123_p2, %p122_p1 }
   0xa   :  { %p125_p4 = pnand %p124_p3, %p118_p0 }
   0xc   :  { %128 = shalt.err (!%p125_p4)
}
   0xd   :  { %s157_s15 = smov 128   ;;  %s158_s16 = smov 8  }
   0xe   :  { %29 = dma.hbm_to_vmem [thread:$0]  %s191_s1, 256, %s24_s13, [#allocation3], %s157_s15, %s157_s15, %s158_s16  }
   0xf   :  { %149 = dma.done.wait [#allocation5], 16  }
  0x10   :  { %150 = vsyncadd [#allocation5], 4294967280 }
  0x11   :  { %151 = dma.done.wait [#allocation3], 256  }
  0x12   :  { %152 = vsyncadd [#allocation3], 4294967040 }
  0x13   :  { %36 = sfence }
  0x14   :  { %s37_s0 = sld [smem:[#allocation2]]  ;;  %v44_v0 = vld [vmem:[#allocation6] sm:$0xff]  ;;  %v48_v1 = vld [vmem:[#allocation6 + $0x8] sm:$0xff]  ;;  %s159_s24 = smov [#allocation7]  }
  0x15   :  { %s90_s19 = sld [smem:[#allocation2 + $0x1]]  ;;  %s77_s25 = sshll.u32 %s159_s24, 4  ;;  %s78_s25 = int_to_ptr.vmem [resolvable:$true] %s77_s25 }
  0x16   :  { %s91_s20 = sld [smem:[#allocation2 + $0x2]]  ;;  %s129_s26 = scalar_lea.vmem %s78_s25, 384 }
  0x17   :  { %s92_s21 = sld [smem:[#allocation2 + $0x3]]  ;;  %p130_p5 = scmp.ne.s32.totalorder %s78_s25, %s129_s26 }
  0x18   :  { %s93_s22 = sld [smem:[#allocation2 + $0x4]]  ;;  %p134_p6 = scmp.lt.s32.totalorder %s78_s25, %s78_s25 }
  0x19   :  { %s94_s23 = sld [smem:[#allocation2 + $0x5]]  ;;  %p135_p7 = scmp.lt.s32.totalorder %s129_s26, %s129_s26 }
  0x1a   :  { %v45_v2 = vstv %s37_s0  ;;  %s95_s1 = sld [smem:[#allocation2 + $0x6]] }
  0x1b   :  { %v46_v3 = vsub.f32 %v44_v0, %v45_v2  ;;  %v49_v4 = vstv %s90_s19  ;;  %p136_p8 = por %p135_p7, %p134_p6 }
  0x1c   :  { %v50_v5 = vsub.f32 %v48_v1, %v49_v4  ;;  %v51_v6 = vstv %s91_s20 }
  0x1d   :  { %v52_v7 = vmul.f32 %v51_v6, %v46_v3  ;;  %v53_v8 = vstv %s92_s21  ;;  %p137_p9 = pnand %p136_p8, %p130_p5 }
  0x1e   :  { %v54_v9 = vmul.f32 %v53_v8, %v50_v5  ;;  %v56_v10 = vstv %s93_s22 }
  0x1f   :  { %v57_v11 = vmul.f32 %v56_v10, %v46_v3  ;;  %v58_v12 = vstv %s94_s23 }
  0x20   :  { %v55_v13 = vadd.f32 %v54_v9, %v52_v7  ;;  %v59_v14 = vmul.f32 %v58_v12, %v50_v5  ;;  %v65_v19 = vstv %s95_s1 }
  0x22   :  { %v60_v15 = vadd.f32 %v59_v14, %v57_v11  ;;  %v61_v16 = vmul.f32 %v55_v13, %v46_v3  ;;  %69 = vst [vmem:[#allocation7 + $0x8] sm:$0xff] %v55_v13 }
  0x24   :  { %v62_v17 = vmul.f32 %v60_v15, %v50_v5  ;;  %71 = vst [vmem:[#allocation7 + $0x10] sm:$0xff] %v60_v15 }
  0x26   :  { %v63_v18 = vadd.f32 %v62_v17, %v61_v16 }
  0x28   :  { %v64_v20 = vmul.f32 0.5, %v63_v18 }
  0x2a   :  { %v66_v21 = vadd.f32 %v65_v19, %v64_v20 }
  0x2c   :  { %67 = vst [vmem:[#allocation7] sm:$0xff] %v66_v21 }
  0x2d   :  { %140 = shalt.err (!%p137_p9)
}
  0x2e   :  { %83 = dma.vmem_to_hbm [thread:$0]  %s78_s25, 384, %s192_s2, [#allocation4], %s157_s15, %s157_s15, %s158_s16  }
  0x2f   :  { %153 = dma.done.wait [#allocation4], 384  }
  0x30   :  { %154 = vsyncadd [#allocation4], 4294966912 }
  0x31   :  { %87 = vsyncpa [#allocation3], 1 }
  0x32   :  { %88 = vsyncpa [#allocation4], 1 }
  0x33   :  { %89 = vsyncpa [#allocation5], 1 }

</bundles_post_ra>
